<compile_context>
chip_gen: v7x
topology: tpu7x:2x2x1
jax: 0.10.0
libtpu: 0.0.40
codegen_flags: <defaults>
</compile_context>

<pallas_src>
import math
from functools import partial

import jax
import jax.numpy as jnp
from jax.experimental import pallas as pl
from jax.experimental.pallas import tpu as pltpu

_LANES = 512  # lane-dense last dim (multiple of 128) -> wide unmasked vector stores


def _round_up(x, m):
    return ((x + m - 1) // m) * m


def _lsoft_kernel(beta, y_pred_ref, y_true_ref, out_ref):
    # beta is a compile-time Python float baked into the kernel.
    p = y_pred_ref[...].astype(jnp.float32)
    t = y_true_ref[...].astype(jnp.float32)

    # (beta*t + (1-beta)*p) * t  ==  (p + beta*(t-p)) * t
    t_upd = (p + beta * (t - p)) * t

    # BCE with torch's -100 clamp on the log terms.
    # -(t_upd*log_p + (1-t_upd)*log_1mp) == t_upd*(log_1mp - log_p) - log_1mp
    log_p = jnp.maximum(jnp.log(p), -100.0)       # EUP
    log_1mp = jnp.maximum(jnp.log(1.0 - p), -100.0)  # EUP
    out_ref[...] = (t_upd * (log_1mp - log_p) - log_1mp).astype(out_ref.dtype)


@partial(jax.jit, static_argnames=("beta", "out_dtype"))
def lsoft_loss(y_pred, y_true, beta, out_dtype=None):
    """Elementwise LSoft BCE loss. y_pred, y_true: same shape; beta: Python float."""
    assert y_pred.shape == y_true.shape
    orig_shape = y_pred.shape
    out_dtype = jnp.dtype(out_dtype) if out_dtype is not None else jnp.dtype(y_pred.dtype)
    total = math.prod(orig_shape) if orig_shape else 1

    if total == 0:
        return jnp.zeros(orig_shape, out_dtype)

    in_itemsize = jnp.dtype(y_pred.dtype).itemsize
    out_itemsize = out_dtype.itemsize
    sub = max(8, 32 // max(in_itemsize, 1))  # sublane multiple for packed dtypes

    rows = -(-total // _LANES)

    if rows <= sub:
        # Single (possibly partial) block covering the whole array; block dim
        # equals the array dim so the (8,128) rule is satisfied.
        block_rows = rows
    else:
        # ~3 MiB per input tile (HBM-bound sweet spot), but never let the grid
        # collapse below ~8 steps: keeps megacore split (v7x 2 TCs) + pipelining.
        target_rows = (3 << 20) // (_LANES * max(in_itemsize, 1))
        target_rows = max(sub, min(4096, (target_rows // sub) * sub))
        split_rows = _round_up(-(-rows // 8), sub)
        block_rows = max(sub, min(target_rows, split_rows))

    padded_total = rows * _LANES
    yp_flat = y_pred.reshape(-1)
    yt_flat = y_true.reshape(-1)
    if padded_total != total:
        pad = padded_total - total
        # Zero padding is numerically safe (clamped logs); padded region is sliced off.
        yp_flat = jnp.pad(yp_flat, (0, pad))
        yt_flat = jnp.pad(yt_flat, (0, pad))

    yp2 = yp_flat.reshape(rows, _LANES)
    yt2 = yt_flat.reshape(rows, _LANES)

    grid = (pl.cdiv(rows, block_rows),)

    # 2 inputs + 1 output, double-buffered tiles (+ headroom), capped at 32 MiB
    # which is within every generation's scoped-VMEM budget.
    in_tile = block_rows * _LANES * in_itemsize
    out_tile = block_rows * _LANES * out_itemsize
    need = 4 * in_tile + 2 * out_tile
    vmem_limit = int(min(32 * 1024 * 1024, max(4 * 1024 * 1024, need + (2 << 20))))

    cost = pl.CostEstimate(
        flops=10 * padded_total,
        transcendentals=2 * padded_total,
        bytes_accessed=2 * padded_total * in_itemsize + padded_total * out_itemsize,
    )

    out2 = pl.pallas_call(
        partial(_lsoft_kernel, float(beta)),
        out_shape=jax.ShapeDtypeStruct((rows, _LANES), out_dtype),
        grid=grid,
        in_specs=[
            pl.BlockSpec((block_rows, _LANES), lambda i: (i, 0)),
            pl.BlockSpec((block_rows, _LANES), lambda i: (i, 0)),
        ],
        out_specs=pl.BlockSpec((block_rows, _LANES), lambda i: (i, 0)),
        compiler_params=pltpu.CompilerParams(
            dimension_semantics=("parallel",),
            vmem_limit_bytes=vmem_limit,
        ),
        cost_estimate=cost,
    )(yp2, yt2)

    if padded_total != total:
        return out2.reshape(-1)[:total].reshape(orig_shape)
    return out2.reshape(orig_shape)


def _reference(y_pred, y_true, beta):
    y_pred = y_pred.astype(jnp.float32)
    y_true = y_true.astype(jnp.float32)
    t_upd = (beta * y_true + (1.0 - beta) * y_pred) * y_true
    log_p = jnp.maximum(jnp.log(y_pred), -100.0)
    log_1mp = jnp.maximum(jnp.log(1.0 - y_pred), -100.0)
    return -(t_upd * log_p + (1.0 - t_upd) * log_1mp)


if __name__ == "__main__":
    key = jax.random.PRNGKey(0)
    k1, k2 = jax.random.split(key)
    beta = 0.7

    # Segmentation-style BCE use-case: NCHW probabilities vs binary labels.
    shape = (2, 4, 16, 16)
    y_pred = jax.nn.sigmoid(jax.random.normal(k1, shape, dtype=jnp.float32))
    y_true = (jax.random.uniform(k2, shape) > 0.5).astype(jnp.float32)

    out = jax.block_until_ready(lsoft_loss(y_pred, y_true, beta=beta))
    ref = _reference(y_pred, y_true, beta)
    assert out.shape == shape and out.dtype == y_pred.dtype
    assert jnp.allclose(out.astype(jnp.float32), ref, atol=1e-5, rtol=1e-5)

    # Odd-sized shape: exercises the (small) pad + slice-back path.
    shape2 = (3, 5, 7, 9)
    yp2 = jax.nn.sigmoid(jax.random.normal(k1, shape2, dtype=jnp.float32))
    yt2 = (jax.random.uniform(k2, shape2) > 0.5).astype(jnp.float32)
    out2 = jax.block_until_ready(lsoft_loss(yp2, yt2, beta=beta))
    assert jnp.allclose(out2, _reference(yp2, yt2, beta), atol=1e-5, rtol=1e-5)

    # Medium shape: exercises a multi-step grid (partial edge block + pipelining).
    shape3 = (4, 4, 64, 64)
    yp3 = jax.nn.sigmoid(jax.random.normal(k1, shape3, dtype=jnp.float32))
    yt3 = (jax.random.uniform(k2, shape3) > 0.5).astype(jnp.float32)
    out3 = jax.block_until_ready(lsoft_loss(yp3, yt3, beta=beta))
    assert jnp.allclose(out3, _reference(yp3, yt3, beta), atol=1e-5, rtol=1e-5)

    # bf16 inputs (native-dtype I/O path), loose tolerance for bf16 output rounding.
    ypb = y_pred.astype(jnp.bfloat16)
    ytb = y_true.astype(jnp.bfloat16)
    outb = jax.block_until_ready(lsoft_loss(ypb, ytb, beta=beta))
    assert outb.dtype == jnp.bfloat16
    assert jnp.allclose(outb.astype(jnp.float32), _reference(ypb, ytb, beta),
                        atol=5e-2, rtol=2e-2)

    # Opt-in bf16 output for f32 inputs (saves 1/3 of the HBM write traffic).
    outc = jax.block_until_ready(lsoft_loss(y_pred, y_true, beta=beta,
                                            out_dtype=jnp.bfloat16))
    assert outc.dtype == jnp.bfloat16
    assert jnp.allclose(outc.astype(jnp.float32), ref, atol=5e-2, rtol=2e-2)

    print("KERNEL_OK")
</pallas_src>

<mosaic_0001>
module attributes {stable_mosaic.version = 11 : i64} {
  func.func @_lsoft_kernel(%arg0: i32, %arg1: memref<4x512xf32, #tpu.memory_space<vmem>>, %arg2: memref<4x512xf32, #tpu.memory_space<vmem>>, %arg3: memref<4x512xf32, #tpu.memory_space<vmem>>) attributes {dimension_semantics = [#tpu.dimension_semantics<parallel>], iteration_bounds = array<i64: 1>, scalar_prefetch = 0 : i64, scratch_operands = 0 : i64, tpu.core_type = #tpu.core_type<tc>, window_params = [{transform_indices = @transform_0, window_bounds = array<i64: 4, 512>}, {transform_indices = @transform_1, window_bounds = array<i64: 4, 512>}, {transform_indices = @transform_2, window_bounds = array<i64: 4, 512>}]} {
    %c0 = arith.constant 0 : index
    %c0_0 = arith.constant 0 : index
    %0 = vector.load %arg1[%c0, %c0_0] : memref<4x512xf32, #tpu.memory_space<vmem>>, vector<4x512xf32>
    %c0_1 = arith.constant 0 : index
    %c0_2 = arith.constant 0 : index
    %1 = vector.load %arg2[%c0_1, %c0_2] : memref<4x512xf32, #tpu.memory_space<vmem>>, vector<4x512xf32>
    %2 = arith.subf %1, %0 : vector<4x512xf32>
    %cst = arith.constant 0.699999988 : f32
    %3 = vector.broadcast %cst : f32 to vector<4x512xf32>
    %4 = arith.mulf %3, %2 : vector<4x512xf32>
    %5 = arith.addf %0, %4 : vector<4x512xf32>
    %6 = arith.mulf %5, %1 : vector<4x512xf32>
    %7 = math.log %0 : vector<4x512xf32>
    %cst_3 = arith.constant -1.000000e+02 : f32
    %8 = vector.broadcast %cst_3 : f32 to vector<4x512xf32>
    %9 = arith.maximumf %7, %8 : vector<4x512xf32>
    %cst_4 = arith.constant 1.000000e+00 : f32
    %10 = vector.broadcast %cst_4 : f32 to vector<4x512xf32>
    %11 = arith.subf %10, %0 : vector<4x512xf32>
    %12 = math.log %11 : vector<4x512xf32>
    %cst_5 = arith.constant -1.000000e+02 : f32
    %13 = vector.broadcast %cst_5 : f32 to vector<4x512xf32>
    %14 = arith.maximumf %12, %13 : vector<4x512xf32>
    %15 = arith.subf %14, %9 : vector<4x512xf32>
    %16 = arith.mulf %6, %15 : vector<4x512xf32>
    %17 = arith.subf %16, %14 : vector<4x512xf32>
    %c0_6 = arith.constant 0 : index
    %c0_7 = arith.constant 0 : index
    %18 = vector.load %arg3[%c0_6, %c0_7] : memref<4x512xf32, #tpu.memory_space<vmem>>, vector<4x512xf32>
    tpu.vector_store %arg3[%c0_6, %c0_7], %17 {strides = array<i32>} : memref<4x512xf32, #tpu.memory_space<vmem>>, vector<4x512xf32>,
    return
  }
  func.func @transform_0(%arg0: i32) -> (i32, i32) {
    %c0_i32 = arith.constant 0 : i32
    %c0_i32_0 = arith.constant 0 : i32
    return %arg0, %c0_i32 : i32, i32
  }
  func.func @transform_1(%arg0: i32) -> (i32, i32) {
    %c0_i32 = arith.constant 0 : i32
    %c0_i32_0 = arith.constant 0 : i32
    return %arg0, %c0_i32 : i32, i32
  }
  func.func @transform_2(%arg0: i32) -> (i32, i32) {
    %c0_i32 = arith.constant 0 : i32
    %c0_i32_0 = arith.constant 0 : i32
    return %arg0, %c0_i32 : i32, i32
  }
}

</mosaic_0001>

<bundles_post_ra>
// kernel: lsoft_loss.1
= control target key start
LH: loop header
LB: loop body
LE: loop exit
PB: predicated region body
PF: predicated region fallthrough
CT: control target
= control target key end

     0   :  { %s90_s0 = inlined_call_operand.vmem [shape: f32[4,512], index: 0, kind: input, shape index: {}]   ;;  %s91_s1 = inlined_call_operand.vmem [shape: f32[4,512], index: 1, kind: input, shape index: {}]   ;;  %s92_s2 = inlined_call_operand.vmem [shape: f32[4,512], index: 2, kind: output, shape index: {}]  }
   0x1   :  { %v11_v0 = vld [vmem:[%s90_s0] sm:$0xff]  ;;  %v12_v1 = vld [vmem:[%s90_s0 + $0x8] sm:$0xff] }
   0x2   :  { %v13_v2 = vld [vmem:[%s91_s1] sm:$0xff]  ;;  %49 = vlog2.f32 %v11_v0  ;;  %v29_v3 = vsub.f32 1.0, %v11_v0  ;;  %v30_v4 = vsub.f32 1.0, %v12_v1  ;;  %v14_v5 = vld [vmem:[%s91_s1 + $0x8] sm:$0xff] }
   0x3   :  { %51 = vlog2.f32 %v12_v1  ;;  %v15_v6 = vsub.f32 %v13_v2, %v11_v0  ;;  %v16_v7 = vsub.f32 %v14_v5, %v12_v1 }
   0x4   :  { %53 = vlog2.f32 %v29_v3 }
   0x5   :  { %55 = vlog2.f32 %v30_v4  ;;  %v17_v8 = vmul.f32 0.7, %v15_v6  ;;  %v18_v9 = vmul.f32 0.7, %v16_v7 }
   0x7   :  { %v19_v12 = vadd.f32 %v17_v8, %v11_v0  ;;  %v20_v15 = vadd.f32 %v18_v9, %v12_v1 }
   0x9   :  { %v21_v22 = vmul.f32 %v19_v12, %v13_v2  ;;  %v22_v24 = vmul.f32 %v20_v15, %v14_v5 }
   0xc   :  { %v50_v10 = vpop.eup %49 }
   0xd   :  { %v52_v11 = vpop.eup %51  ;;  %v24_v13 = vmul.f32 0.6931472, %v50_v10 }
   0xe   :  { %v54_v14 = vpop.eup %53  ;;  %v26_v16 = vmul.f32 0.6931472, %v52_v11 }
   0xf   :  { %v56_v17 = vpop.eup %55  ;;  %v27_v18 = vmax.f32 %v24_v13, -100.0  ;;  %v32_v19 = vmul.f32 0.6931472, %v54_v14 }
  0x10   :  { %v28_v20 = vmax.f32 %v26_v16, -100.0  ;;  %v34_v21 = vmul.f32 0.6931472, %v56_v17 }
  0x11   :  { %v35_v23 = vmax.f32 %v32_v19, -100.0 }
  0x12   :  { %v36_v25 = vmax.f32 %v34_v21, -100.0 }
  0x13   :  { %v37_v26 = vsub.f32 %v35_v23, %v27_v18 }
  0x14   :  { %v38_v27 = vsub.f32 %v36_v25, %v28_v20 }
  0x15   :  { %v39_v28 = vmul.f32 %v37_v26, %v21_v22 }
  0x16   :  { %v40_v29 = vmul.f32 %v38_v27, %v22_v24 }
  0x17   :  { %v41_v30 = vsub.f32 %v39_v28, %v35_v23 }
  0x18   :  { %v42_v31 = vsub.f32 %v40_v29, %v36_v25 }
  0x19   :  { %43 = vst [vmem:[%s92_s2] sm:$0xff] %v41_v30 }
  0x1a   :  { %44 = vst [vmem:[%s92_s2 + $0x8] sm:$0xff] %v42_v31 }

</bundles_post_ra>
